<compile_context>
chip_gen: v7x
topology: tpu7x:2x2x1
jax: 0.10.0
libtpu: 0.0.40
codegen_flags: <defaults>
</compile_context>

<pallas_src>
import math
import functools
import jax
import jax.numpy as jnp
from jax import lax
from jax.experimental import pallas as pl
from jax.experimental.pallas import tpu as pltpu


def _round_up(n, m):
    return ((n + m - 1) // m) * m


def _choose_block_rows(n, max_rows):
    """Pick a batch tile: multiple of 8, as large as allowed, >=2 grid steps
    whenever the batch is big enough to split (v7x megacore)."""
    n8 = _round_up(max(n, 1), 8)
    tb = min(max_rows, n8)
    if n8 >= 16 and pl.cdiv(n8, tb) < 2:
        tb = _round_up(pl.cdiv(n8, 2), 8)
    return tb


def classifier_kernel(emb_ref, x_ref, w1_ref, b1_ref, w2_ref, b2_ref,
                      gamma_ref, beta_ref, wout_ref, bout_ref, o_ref,
                      *, length_dim):
    x = x_ref[...].astype(jnp.float32)        # (TB, dim)
    emb = emb_ref[...].astype(jnp.float32)    # (TB, length_dim)  sin/cos table

    # ---- Linear(length_dim, dim): K is tiny (e.g. 4) -> rank-1 broadcast
    # multiply-adds on the VPU instead of a K=4 MXU matmul.
    h = jnp.broadcast_to(b1_ref[...], x.shape).astype(jnp.float32)
    for k in range(length_dim):               # static unroll, length_dim ~ 4
        h = h + emb[:, k:k + 1] * w1_ref[k:k + 1, :]

    # exact GELU (erf) -- matches torch nn.GELU default numerics
    h = 0.5 * h * (1.0 + lax.erf(h * jnp.float32(1.0 / math.sqrt(2.0))))

    # Linear(dim, dim) on the MXU
    h = jnp.dot(h, w2_ref[...], preferred_element_type=jnp.float32) + b2_ref[...]

    # x = x + length_step
    xa = x + h

    # LayerNorm over feature dim, eps=1e-6, biased variance (torch), affine
    mean = jnp.mean(xa, axis=-1, keepdims=True)
    var = jnp.mean((xa - mean) ** 2, axis=-1, keepdims=True)
    xn = (xa - mean) * lax.rsqrt(var + jnp.float32(1e-6))
    xn = xn * gamma_ref[...] + beta_ref[...]

    # final Linear(dim, num_classes); narrow store, no dead columns
    o_ref[...] = (jnp.dot(xn, wout_ref[...], preferred_element_type=jnp.float32)
                  + bout_ref[...]).astype(o_ref.dtype)


def sinusoidal_position_embeddings(t, emb_dim):
    # DDPM-style sinusoidal embedding: [sin(t*f_0..), cos(t*f_0..)], (N, emb_dim).
    half = emb_dim // 2
    freqs = jnp.exp(jnp.arange(half, dtype=jnp.float32)
                    * (-math.log(10000.0) / max(half - 1, 1)))
    ang = t.astype(jnp.float32)[:, None] * freqs[None, :]
    return jnp.concatenate([jnp.sin(ang), jnp.cos(ang)], axis=-1)


def classifier_forward(x, t, params, *, max_block_rows=4096):
    N, dim = x.shape
    num_classes = params["wout"].shape[1]
    length_dim = params["w1"].shape[0]
    # Odd length_dim would silently drop the last sinusoid row (see review).
    assert length_dim % 2 == 0 and length_dim >= 2, "length_dim must be even >= 2"

    TB = _choose_block_rows(N, max_block_rows)
    grid = (pl.cdiv(N, TB),)

    # Tiny (N, length_dim) sin/cos table built in the wrapper -> removes the
    # 4-byte-per-sublane t DMA; the heavy length_step math stays in-kernel.
    emb = sinusoidal_position_embeddings(t, length_dim)

    row_spec = lambda cols: pl.BlockSpec((TB, cols), lambda i: (i, 0))   # batch-tiled
    const_spec = lambda shape: pl.BlockSpec(shape, lambda i: (0, 0))     # resident

    args = (emb, x, params["w1"], params["b1"], params["w2"], params["b2"],
            params["gamma"], params["beta"], params["wout"], params["bout"])
    in_specs = [
        row_spec(length_dim),
        row_spec(dim),
        const_spec(params["w1"].shape),
        const_spec(params["b1"].shape),
        const_spec(params["w2"].shape),
        const_spec(params["b2"].shape),
        const_spec(params["gamma"].shape),
        const_spec(params["beta"].shape),
        const_spec(params["wout"].shape),
        const_spec(params["bout"].shape),
    ]

    param_bytes = sum(int(p.size) * p.dtype.itemsize for p in params.values())
    bytes_accessed = (int(x.size) * x.dtype.itemsize
                      + int(emb.size) * 4
                      + N * num_classes * 4
                      + param_bytes)
    cost = pl.CostEstimate(
        flops=2 * N * (length_dim * dim + dim * dim + dim * num_classes) + 10 * N * dim,
        transcendentals=N * dim,          # erf
        bytes_accessed=bytes_accessed)

    out = pl.pallas_call(
        functools.partial(classifier_kernel, length_dim=length_dim),
        out_shape=jax.ShapeDtypeStruct((N, num_classes), jnp.float32),
        grid=grid,
        in_specs=in_specs,
        out_specs=pl.BlockSpec((TB, num_classes), lambda i: (i, 0)),
        compiler_params=pltpu.CompilerParams(
            dimension_semantics=("parallel",),       # batch tiles shard across TCs
            vmem_limit_bytes=32 * 1024 * 1024),      # same tile fits v5e/v6e/v7x
        cost_estimate=cost,
    )(*args)
    return out


def init_params(key, dim, num_classes, length_dim):
    ks = jax.random.split(key, 6)
    s = 0.02
    return dict(
        w1=jax.random.normal(ks[0], (length_dim, dim), jnp.float32) * s,
        b1=jax.random.normal(ks[1], (1, dim), jnp.float32) * s,
        w2=jax.random.normal(ks[2], (dim, dim), jnp.float32) * s,
        b2=jax.random.normal(ks[3], (1, dim), jnp.float32) * s,
        gamma=jnp.ones((1, dim), jnp.float32),
        beta=jnp.zeros((1, dim), jnp.float32),
        wout=jax.random.normal(ks[4], (dim, num_classes), jnp.float32) * s,
        bout=jax.random.normal(ks[5], (1, num_classes), jnp.float32) * s,
    )


def classifier_reference(x, t, params):
    # Pure-JAX reference for a correctness sanity check.
    length_dim = params["w1"].shape[0]
    temb = sinusoidal_position_embeddings(t, length_dim)
    h = temb @ params["w1"] + params["b1"]
    h = 0.5 * h * (1.0 + lax.erf(h / jnp.sqrt(2.0)))
    h = h @ params["w2"] + params["b2"]
    xa = x + h
    mean = jnp.mean(xa, axis=-1, keepdims=True)
    var = jnp.mean((xa - mean) ** 2, axis=-1, keepdims=True)
    xn = (xa - mean) / jnp.sqrt(var + 1e-6)
    xn = xn * params["gamma"] + params["beta"]
    return xn @ params["wout"] + params["bout"]


if __name__ == "__main__":
    # Small shapes consistent with the module: batch=8, dim=32, num_classes=3.
    N, dim, num_classes = 8, 32, 3
    length_dim = dim // 7  # default length_dim from __init__ (=4)

    key = jax.random.PRNGKey(0)
    k_x, k_t, k_p = jax.random.split(key, 3)
    x = jax.random.normal(k_x, (N, dim), jnp.float32)
    t = jax.random.uniform(k_t, (N,), jnp.float32, minval=10.0, maxval=5000.0)

    params = init_params(k_p, dim, num_classes, length_dim)

    out = classifier_forward(x, t, params)
    out = jax.block_until_ready(out)

    ref = classifier_reference(x, t, params)
    assert out.shape == (N, num_classes)
    assert jnp.allclose(out, ref, atol=1e-4, rtol=1e-4), "mismatch vs reference"

    print("KERNEL_OK")
</pallas_src>

<mosaic_0001>
module attributes {stable_mosaic.version = 11 : i64} {
  func.func @classifier_kernel(%arg0: i32, %arg1: memref<8x4xf32, #tpu.memory_space<vmem>>, %arg2: memref<8x32xf32, #tpu.memory_space<vmem>>, %arg3: memref<4x32xf32, #tpu.memory_space<vmem>>, %arg4: memref<1x32xf32, #tpu.memory_space<vmem>>, %arg5: memref<32x32xf32, #tpu.memory_space<vmem>>, %arg6: memref<1x32xf32, #tpu.memory_space<vmem>>, %arg7: memref<1x32xf32, #tpu.memory_space<vmem>>, %arg8: memref<1x32xf32, #tpu.memory_space<vmem>>, %arg9: memref<32x3xf32, #tpu.memory_space<vmem>>, %arg10: memref<1x3xf32, #tpu.memory_space<vmem>>, %arg11: memref<8x3xf32, #tpu.memory_space<vmem>>) attributes {dimension_semantics = [#tpu.dimension_semantics<parallel>], iteration_bounds = array<i64: 1>, scalar_prefetch = 0 : i64, scratch_operands = 0 : i64, tpu.core_type = #tpu.core_type<tc>, window_params = [{transform_indices = @transform_0, window_bounds = array<i64: 8, 4>}, {transform_indices = @transform_1, window_bounds = array<i64: 8, 32>}, {pipeline_mode = #tpu.pipeline_mode<synchronous>, transform_indices = @transform_2, window_bounds = array<i64: 4, 32>}, {pipeline_mode = #tpu.pipeline_mode<synchronous>, transform_indices = @transform_3, window_bounds = array<i64: 1, 32>}, {pipeline_mode = #tpu.pipeline_mode<synchronous>, transform_indices = @transform_4, window_bounds = array<i64: 32, 32>}, {pipeline_mode = #tpu.pipeline_mode<synchronous>, transform_indices = @transform_5, window_bounds = array<i64: 1, 32>}, {pipeline_mode = #tpu.pipeline_mode<synchronous>, transform_indices = @transform_6, window_bounds = array<i64: 1, 32>}, {pipeline_mode = #tpu.pipeline_mode<synchronous>, transform_indices = @transform_7, window_bounds = array<i64: 1, 32>}, {pipeline_mode = #tpu.pipeline_mode<synchronous>, transform_indices = @transform_8, window_bounds = array<i64: 32, 3>}, {pipeline_mode = #tpu.pipeline_mode<synchronous>, transform_indices = @transform_9, window_bounds = array<i64: 1, 3>}, {transform_indices = @transform_10, window_bounds = array<i64: 8, 3>}]} {
    %c0 = arith.constant 0 : index
    %c0_0 = arith.constant 0 : index
    %0 = vector.load %arg2[%c0, %c0_0] : memref<8x32xf32, #tpu.memory_space<vmem>>, vector<8x32xf32>
    %c0_1 = arith.constant 0 : index
    %c0_2 = arith.constant 0 : index
    %1 = vector.load %arg1[%c0_1, %c0_2] : memref<8x4xf32, #tpu.memory_space<vmem>>, vector<8x4xf32>
    %c0_3 = arith.constant 0 : index
    %c0_4 = arith.constant 0 : index
    %2 = vector.load %arg4[%c0_3, %c0_4] : memref<1x32xf32, #tpu.memory_space<vmem>>, vector<1x32xf32>
    %3 = vector.shape_cast %2 : vector<1x32xf32> to vector<1x32xf32>
    %4 = vector.broadcast %3 : vector<1x32xf32> to vector<8x32xf32>
    %5 = vector.extract_strided_slice %1 {offsets = [0, 0], sizes = [8, 1], strides = [1, 1]} : vector<8x4xf32> to vector<8x1xf32>
    %c0_5 = arith.constant 0 : index
    %c0_6 = arith.constant 0 : index
    %6 = vector.load %arg3[%c0_5, %c0_6] : memref<4x32xf32, #tpu.memory_space<vmem>>, vector<1x32xf32>
    %7 = vector.broadcast %5 : vector<8x1xf32> to vector<8x32xf32>
    %8 = vector.broadcast %6 : vector<1x32xf32> to vector<8x32xf32>
    %9 = arith.mulf %7, %8 : vector<8x32xf32>
    %10 = arith.addf %4, %9 : vector<8x32xf32>
    %11 = vector.extract_strided_slice %1 {offsets = [0, 1], sizes = [8, 1], strides = [1, 1]} : vector<8x4xf32> to vector<8x1xf32>
    %c1 = arith.constant 1 : index
    %c0_7 = arith.constant 0 : index
    %12 = vector.load %arg3[%c1, %c0_7] : memref<4x32xf32, #tpu.memory_space<vmem>>, vector<1x32xf32>
    %13 = vector.broadcast %11 : vector<8x1xf32> to vector<8x32xf32>
    %14 = vector.broadcast %12 : vector<1x32xf32> to vector<8x32xf32>
    %15 = arith.mulf %13, %14 : vector<8x32xf32>
    %16 = arith.addf %10, %15 : vector<8x32xf32>
    %17 = vector.extract_strided_slice %1 {offsets = [0, 2], sizes = [8, 1], strides = [1, 1]} : vector<8x4xf32> to vector<8x1xf32>
    %c2 = arith.constant 2 : index
    %c0_8 = arith.constant 0 : index
    %18 = vector.load %arg3[%c2, %c0_8] : memref<4x32xf32, #tpu.memory_space<vmem>>, vector<1x32xf32>
    %19 = vector.broadcast %17 : vector<8x1xf32> to vector<8x32xf32>
    %20 = vector.broadcast %18 : vector<1x32xf32> to vector<8x32xf32>
    %21 = arith.mulf %19, %20 : vector<8x32xf32>
    %22 = arith.addf %16, %21 : vector<8x32xf32>
    %23 = vector.extract_strided_slice %1 {offsets = [0, 3], sizes = [8, 1], strides = [1, 1]} : vector<8x4xf32> to vector<8x1xf32>
    %c3 = arith.constant 3 : index
    %c0_9 = arith.constant 0 : index
    %24 = vector.load %arg3[%c3, %c0_9] : memref<4x32xf32, #tpu.memory_space<vmem>>, vector<1x32xf32>
    %25 = vector.broadcast %23 : vector<8x1xf32> to vector<8x32xf32>
    %26 = vector.broadcast %24 : vector<1x32xf32> to vector<8x32xf32>
    %27 = arith.mulf %25, %26 : vector<8x32xf32>
    %28 = arith.addf %22, %27 : vector<8x32xf32>
    %cst = arith.constant 5.000000e-01 : f32
    %29 = vector.broadcast %cst : f32 to vector<8x32xf32>
    %30 = arith.mulf %29, %28 : vector<8x32xf32>
    %cst_10 = arith.constant 0.707106769 : f32
    %31 = vector.broadcast %cst_10 : f32 to vector<8x32xf32>
    %32 = arith.mulf %28, %31 : vector<8x32xf32>
    %33 = math.erf %32 : vector<8x32xf32>
    %cst_11 = arith.constant 1.000000e+00 : f32
    %34 = vector.broadcast %cst_11 : f32 to vector<8x32xf32>
    %35 = arith.addf %34, %33 : vector<8x32xf32>
    %36 = arith.mulf %30, %35 : vector<8x32xf32>
    %c0_12 = arith.constant 0 : index
    %c0_13 = arith.constant 0 : index
    %37 = vector.load %arg5[%c0_12, %c0_13] : memref<32x32xf32, #tpu.memory_space<vmem>>, vector<32x32xf32>
    %cst_14 = arith.constant dense<0.000000e+00> : vector<8x32xf32>
    %38 = tpu.matmul %36, %37, %cst_14 {dimension_numbers = #tpu.dot_dimension_numbers<[1], [0], [0], [1], [0, 0, 1, 1], [], []>} : vector<8x32xf32>, vector<32x32xf32>, vector<8x32xf32> -> vector<8x32xf32>
    %c0_15 = arith.constant 0 : index
    %c0_16 = arith.constant 0 : index
    %39 = vector.load %arg6[%c0_15, %c0_16] : memref<1x32xf32, #tpu.memory_space<vmem>>, vector<1x32xf32>
    %40 = vector.broadcast %39 : vector<1x32xf32> to vector<8x32xf32>
    %41 = arith.addf %38, %40 : vector<8x32xf32>
    %42 = arith.addf %0, %41 : vector<8x32xf32>
    %cst_17 = arith.constant dense<0.000000e+00> : vector<8xf32>
    %43 = vector.multi_reduction <add>, %42, %cst_17 [1] : vector<8x32xf32> to vector<8xf32>
    %44 = vector.shape_cast %43 : vector<8xf32> to vector<8x1xf32>
    %cst_18 = arith.constant 3.200000e+01 : f32
    %45 = vector.broadcast %cst_18 : f32 to vector<8x1xf32>
    %46 = arith.divf %44, %45 : vector<8x1xf32>
    %47 = vector.broadcast %46 : vector<8x1xf32> to vector<8x32xf32>
    %48 = arith.subf %42, %47 : vector<8x32xf32>
    %49 = arith.mulf %48, %48 : vector<8x32xf32>
    %cst_19 = arith.constant dense<0.000000e+00> : vector<8xf32>
    %50 = vector.multi_reduction <add>, %49, %cst_19 [1] : vector<8x32xf32> to vector<8xf32>
    %51 = vector.shape_cast %50 : vector<8xf32> to vector<8x1xf32>
    %cst_20 = arith.constant 3.200000e+01 : f32
    %52 = vector.broadcast %cst_20 : f32 to vector<8x1xf32>
    %53 = arith.divf %51, %52 : vector<8x1xf32>
    %54 = vector.broadcast %46 : vector<8x1xf32> to vector<8x32xf32>
    %55 = arith.subf %42, %54 : vector<8x32xf32>
    %cst_21 = arith.constant 9.99999997E-7 : f32
    %56 = vector.broadcast %cst_21 : f32 to vector<8x1xf32>
    %57 = arith.addf %53, %56 : vector<8x1xf32>
    %58 = math.rsqrt %57 : vector<8x1xf32>
    %59 = vector.broadcast %58 : vector<8x1xf32> to vector<8x32xf32>
    %60 = arith.mulf %55, %59 : vector<8x32xf32>
    %c0_22 = arith.constant 0 : index
    %c0_23 = arith.constant 0 : index
    %61 = vector.load %arg7[%c0_22, %c0_23] : memref<1x32xf32, #tpu.memory_space<vmem>>, vector<1x32xf32>
    %62 = vector.broadcast %61 : vector<1x32xf32> to vector<8x32xf32>
    %63 = arith.mulf %60, %62 : vector<8x32xf32>
    %c0_24 = arith.constant 0 : index
    %c0_25 = arith.constant 0 : index
    %64 = vector.load %arg8[%c0_24, %c0_25] : memref<1x32xf32, #tpu.memory_space<vmem>>, vector<1x32xf32>
    %65 = vector.broadcast %64 : vector<1x32xf32> to vector<8x32xf32>
    %66 = arith.addf %63, %65 : vector<8x32xf32>
    %c0_26 = arith.constant 0 : index
    %c0_27 = arith.constant 0 : index
    %67 = vector.load %arg9[%c0_26, %c0_27] : memref<32x3xf32, #tpu.memory_space<vmem>>, vector<32x3xf32>
    %cst_28 = arith.constant dense<0.000000e+00> : vector<8x3xf32>
    %68 = tpu.matmul %66, %67, %cst_28 {dimension_numbers = #tpu.dot_dimension_numbers<[1], [0], [0], [1], [0, 0, 1, 1], [], []>} : vector<8x32xf32>, vector<32x3xf32>, vector<8x3xf32> -> vector<8x3xf32>
    %c0_29 = arith.constant 0 : index
    %c0_30 = arith.constant 0 : index
    %69 = vector.load %arg10[%c0_29, %c0_30] : memref<1x3xf32, #tpu.memory_space<vmem>>, vector<1x3xf32>
    %70 = vector.broadcast %69 : vector<1x3xf32> to vector<8x3xf32>
    %71 = arith.addf %68, %70 : vector<8x3xf32>
    %c0_31 = arith.constant 0 : index
    %c0_32 = arith.constant 0 : index
    %72 = vector.load %arg11[%c0_31, %c0_32] : memref<8x3xf32, #tpu.memory_space<vmem>>, vector<8x3xf32>
    tpu.vector_store %arg11[%c0_31, %c0_32], %71 {strides = array<i32>} : memref<8x3xf32, #tpu.memory_space<vmem>>, vector<8x3xf32>,
    return
  }
  func.func @transform_0(%arg0: i32) -> (i32, i32) {
    %c0_i32 = arith.constant 0 : i32
    %c0_i32_0 = arith.constant 0 : i32
    return %arg0, %c0_i32 : i32, i32
  }
  func.func @transform_1(%arg0: i32) -> (i32, i32) {
    %c0_i32 = arith.constant 0 : i32
    %c0_i32_0 = arith.constant 0 : i32
    return %arg0, %c0_i32 : i32, i32
  }
  func.func @transform_2(%arg0: i32) -> (i32, i32) {
    %c0_i32 = arith.constant 0 : i32
    %c0_i32_0 = arith.constant 0 : i32
    %c0_i32_1 = arith.constant 0 : i32
    return %c0_i32, %c0_i32_0 : i32, i32
  }
  func.func @transform_3(%arg0: i32) -> (i32, i32) {
    %c0_i32 = arith.constant 0 : i32
    %c0_i32_0 = arith.constant 0 : i32
    %c0_i32_1 = arith.constant 0 : i32
    return %c0_i32, %c0_i32_0 : i32, i32
  }
  func.func @transform_4(%arg0: i32) -> (i32, i32) {
    %c0_i32 = arith.constant 0 : i32
    %c0_i32_0 = arith.constant 0 : i32
    %c0_i32_1 = arith.constant 0 : i32
    return %c0_i32, %c0_i32_0 : i32, i32
  }
  func.func @transform_5(%arg0: i32) -> (i32, i32) {
    %c0_i32 = arith.constant 0 : i32
    %c0_i32_0 = arith.constant 0 : i32
    %c0_i32_1 = arith.constant 0 : i32
    return %c0_i32, %c0_i32_0 : i32, i32
  }
  func.func @transform_6(%arg0: i32) -> (i32, i32) {
    %c0_i32 = arith.constant 0 : i32
    %c0_i32_0 = arith.constant 0 : i32
    %c0_i32_1 = arith.constant 0 : i32
    return %c0_i32, %c0_i32_0 : i32, i32
  }
  func.func @transform_7(%arg0: i32) -> (i32, i32) {
    %c0_i32 = arith.constant 0 : i32
    %c0_i32_0 = arith.constant 0 : i32
    %c0_i32_1 = arith.constant 0 : i32
    return %c0_i32, %c0_i32_0 : i32, i32
  }
  func.func @transform_8(%arg0: i32) -> (i32, i32) {
    %c0_i32 = arith.constant 0 : i32
    %c0_i32_0 = arith.constant 0 : i32
    %c0_i32_1 = arith.constant 0 : i32
    return %c0_i32, %c0_i32_0 : i32, i32
  }
  func.func @transform_9(%arg0: i32) -> (i32, i32) {
    %c0_i32 = arith.constant 0 : i32
    %c0_i32_0 = arith.constant 0 : i32
    %c0_i32_1 = arith.constant 0 : i32
    return %c0_i32, %c0_i32_0 : i32, i32
  }
  func.func @transform_10(%arg0: i32) -> (i32, i32) {
    %c0_i32 = arith.constant 0 : i32
    %c0_i32_0 = arith.constant 0 : i32
    return %arg0, %c0_i32 : i32, i32
  }
}

</mosaic_0001>

<bundles_post_ra>
// kernel: tpu_custom_call.1
= control target key start
LH: loop header
LB: loop body
LE: loop exit
PB: predicated region body
PF: predicated region fallthrough
CT: control target
= control target key end

     0   :  { %v371_v0 = vmov 0   ;;  %v372_v2 = vmov 2   ;;  %v373_v3 = vmov 1   ;;  %v374_v4 = vmov 3   ;;  %s501_s0 = inlined_call_operand.vmem [shape: f32[8,4], index: 0, kind: input, shape index: {}]   ;;  %s502_s4 = inlined_call_operand.vmem [shape: f32[32,32], index: 4, kind: input, shape index: {}]   ;;  %s503_s2 = inlined_call_operand.vmem [shape: f32[4,32], index: 2, kind: input, shape index: {}]   ;;  %s504_s3 = inlined_call_operand.vmem [shape: f32[1,32], index: 3, kind: input, shape index: {}]   ;;  %s505_s5 = inlined_call_operand.vmem [shape: f32[1,32], index: 5, kind: input, shape index: {}]   ;;  %s506_s1 = inlined_call_operand.vmem [shape: f32[8,32], index: 1, kind: input, shape index: {}]   ;;  %s507_s8 = inlined_call_operand.vmem [shape: f32[32,3], index: 8, kind: input, shape index: {}]   ;;  %s508_s6 = inlined_call_operand.vmem [shape: f32[1,32], index: 6, kind: input, shape index: {}]   ;;  %s509_s7 = inlined_call_operand.vmem [shape: f32[1,32], index: 7, kind: input, shape index: {}]   ;;  %s510_s9 = inlined_call_operand.vmem [shape: f32[1,3], index: 9, kind: input, shape index: {}]   ;;  %s511_s10 = inlined_call_operand.vmem [shape: f32[8,3], index: 10, kind: output, shape index: {}]  }
   0x1   :  { %362 = vset.pattern.permute.xlu0 %v371_v0  ;;  %v36_v1 = vld [vmem:[%s501_s0] sm:$0xff]  ;;  %364 = vset.pattern.permute.xlu1 %v372_v2  ;;  %v95_v6 = vld [vmem:[%s502_s4 + $0x8] sm:$0xff]  ;;  %v375_v8 = vmov 0.0|0.0   ;;  %v96_v9 = vld [vmem:[%s502_s4 + $0x10] sm:$0xff]  ;;  %vm376_vm0 = vmmov 0   ;;  %v377_v12 = vmov 0.0  }
   0x2   :  { %47 = vperm.xlu0 %362, %v36_v1   ;;  %69 = vperm.xlu1 %364, %v36_v1   ;;  %v94_v5 = vld [vmem:[%s502_s4] sm:$0xff]  ;;  %v97_v10 = vld [vmem:[%s502_s4 + $0x18] sm:$0xff]  ;;  %vm105_vm1 = vcmask 261120   ;;  %v211_v48 = vld [vmem:[%s507_s8 + $0x8] sm:$0xff]  ;;  %vm294_vm2 = vcmask 23552  }
   0x3   :  { %v344_v7 = vpack.c.bf16 %v95_v6, %v94_v5  ;;  %343 = vmatprep.subr.bf16.mxu0 %v375_v8  ;;  %349 = vmatprep.subr.bf16.mxu1 %v375_v8  ;;  %v347_v11 = vpack.c.bf16 %v97_v10, %v96_v9  ;;  %v301_v13 = vld [vmem:[%s503_s2] ss:$0 sm:$0xff]  ;;  %v302_v18 = vld [vmem:[%s503_s2 + $0x1] ss:$0 sm:$0xff]  ;;  %v303_v19 = vld [vmem:[%s503_s2 + $0x2] ss:$0 sm:$0xff] }
   0x4   :  { %329 = vmatprep.mubr.msk.f32.mxu0 %vm376_vm0, %v377_v12  ;;  %340 = vmatprep.mubr.msk.f32.mxu1 %vm376_vm0, %v377_v12  ;;  %v300_v17 = vld [vmem:[%s504_s3] ss:$0 sm:$0xff]  ;;  %v304_v21 = vld [vmem:[%s503_s2 + $0x3] ss:$0 sm:$0xff]  ;;  %v212_v49 = vld [vmem:[%s507_s8 + $0x10] sm:$0xff] }
   0x5   :  { %345 = vmatpush3.bf16.msra.mxu0 %v344_v7  ;;  %v305_v35 = vld [vmem:[%s505_s5] ss:$0 sm:$0xff]  ;;  %v213_v51 = vld [vmem:[%s507_s8 + $0x18] sm:$0xff] }
   0x6   :  { %363 = vset.pattern.permute.xlu0 %v373_v3  ;;  %365 = vset.pattern.permute.xlu1 %v374_v4  ;;  %v35_v37 = vld [vmem:[%s506_s1] sm:$0xff]  ;;  %v353_v52 = vpack.c.bf16 %v213_v51, %v212_v49 }
   0x7   :  { %58 = vperm.xlu0 %363, %v36_v1   ;;  %80 = vperm.xlu1 %365, %v36_v1   ;;  %v210_v47 = vld [vmem:[%s507_s8] sm:$0xff] }
   0x8   :  { %346 = vmatprep.subr.bf16.mxu0 %v375_v8  ;;  %v350_v50 = vpack.c.bf16 %v211_v48, %v210_v47  ;;  %v307_v57 = vld [vmem:[%s508_s6] ss:$0 sm:$0xff] }
   0x9   :  { %348 = vmatpush3.bf16.msra.mxu0 %v347_v11  ;;  %v308_v59 = vld [vmem:[%s509_s7] ss:$0 sm:$0xff] }
   0xa   :  { %351 = vmatpush3.bf16.msra.mxu1 %v350_v50  ;;  %v309_v62 = vld [vmem:[%s510_s9] ss:$0 sm:$0xff] }
   0xb   :  { %366 = vset.pattern.permute.xlu0 %v374_v4  ;;  %352 = vmatprep.subr.bf16.mxu1 %v375_v8 }
   0xe   :  { %354 = vmatpush3.bf16.msra.mxu1 %v353_v52 }
  0x81   :  { %v48_v14 = vpop.permute.xlu0 %47  ;;  %v70_v15 = vpop.permute.xlu1 %69 }
  0x82   :  { %v54_v16 = vmul.f32 %v301_v13, %v48_v14  ;;  %v76_v25 = vmul.f32 %v303_v19, %v70_v15 }
  0x84   :  { %v55_v23 = vadd.f32 %v300_v17, %v54_v16 }
  0x86   :  { %v59_v20 = vpop.permute.xlu0 %58  ;;  %v81_v22 = vpop.permute.xlu1 %80 }
  0x87   :  { %v65_v24 = vmul.f32 %v302_v18, %v59_v20  ;;  %v87_v27 = vmul.f32 %v304_v21, %v81_v22 }
  0x89   :  { %v66_v26 = vadd.f32 %v65_v24, %v55_v23 }
  0x8b   :  { %v77_v28 = vadd.f32 %v76_v25, %v66_v26 }
  0x8d   :  { %v88_v29 = vadd.f32 %v87_v27, %v77_v28 }
  0x8f   :  { %v90_v30 = vmul.f32 0.70710677, %v88_v29  ;;  %v89_v32 = vmul.f32 0.5, %v88_v29 }
  0x91   :  { %367 = verf.f32 %v90_v30 }
  0x9b   :  { %v368_v31 = vpop.eup %367 }
  0x9c   :  { %v92_v33 = vadd.f32 1.0, %v368_v31 }
  0x9e   :  { %v93_v34 = vmul.f32 %v92_v33, %v89_v32 }
  0xa0   :  { %330 = vmatmul.mubr.msk.f32.vlgmr.msra.gmra.mrb[0].mxu0 %vm105_vm1, %v93_v34 }
 0x173   :  { %v175_v36 = vpop.f32.mrb[0].mxu0 }
 0x174   :  { %v176_v38 = vadd.f32 %v305_v35, %v175_v36  ;;  %v331_v39 = vpop.f32.mrb[1].mxu0 }
 0x176   :  { %v179_v40 = vadd.f32 %v176_v38, %v35_v37 }
 0x178   :  { %v180_v41 = vsel %vm105_vm1, %v179_v40, 0.0 }
 0x179   :  { %181 = vadd.xlane.f32.xlu1 %v180_v41 }
 0x206   :  { %v182_v42 = vpop.xlane.xlu1 %181 }
 0x207   :  { %v184_v43 = vmul.f32 0.03125, %v182_v42 }
 0x209   :  { %v185_v44 = vsub.f32 %v179_v40, %v184_v43 }
 0x20b   :  { %v186_v45 = vmul.f32 %v185_v44, %v185_v44 }
 0x20d   :  { %v187_v46 = vsel %vm105_vm1, %v186_v45, 0.0 }
 0x20e   :  { %188 = vadd.xlane.f32.xlu0 %v187_v46 }
 0x29b   :  { %v189_v53 = vpop.xlane.xlu0 %188 }
 0x29c   :  { %v190_v54 = vmul.f32 0.03125, %v189_v53 }
 0x29e   :  { %v191_v55 = vadd.f32 1e-06, %v190_v54 }
 0x2a0   :  { %369 = vrsqrt.f32 %v191_v55 }
 0x2aa   :  { %v370_v56 = vpop.eup %369 }
 0x2ab   :  { %v193_v58 = vmul.f32 %v370_v56, %v185_v44 }
 0x2ad   :  { %v201_v60 = vmul.f32 %v307_v57, %v193_v58 }
 0x2af   :  { %v209_v61 = vadd.f32 %v308_v59, %v201_v60 }
 0x2b1   :  { %341 = vmatmul.mubr.msk.f32.vlgmr.msra.gmra.mrb[0].mxu1 %vm105_vm1, %v209_v61 }
 0x384   :  { %v290_v63 = vpop.f32.mrb[0].mxu1 }
 0x385   :  { %v291_v0 = vadd.f32 %v309_v62, %v290_v63  ;;  %v342_v1 = vpop.f32.mrb[1].mxu1 }
 0x387   :  { %295 = vst.msk [vmem:[%s511_s10] sm:$0xff] %vm294_vm2, %v291_v0 }

</bundles_post_ra>
